<compile_context>
chip_gen: v6e
topology: v6e:2x2x1
jax: 0.10.0
libtpu: 0.0.40
codegen_flags: <defaults>
</compile_context>

<pallas_src>
import functools

import jax
import jax.numpy as jnp
from jax.experimental import pallas as pl
from jax.experimental.pallas import tpu as pltpu

_K = 13          # fc1 in_features
_H = 32          # hidden width
_K_PAD = 16      # fc1 contraction dim zero-padded for clean bf16 layout
_LANE = 128      # TPU lane width
_DEFAULT_MAX_TILE_B = 32768   # ~1 MiB bf16 x tile / step; ~10 MiB total VMEM


def _mlp_kernel(x_ref, w1_ref, b1_ref, w2_ref, b2_ref, o_ref):
    # x_ref : (K_PAD, TILE_B) bf16  -- batch on lanes
    # w1_ref: (H, K_PAD)      bf16  -- PyTorch fc1.weight, zero-padded K
    # b1_ref: (H, 1)          f32
    # w2_ref: (H, 1)          f32   -- fc2.weight transposed to a column
    # b2_ref: (1, 1)          f32   -- SMEM scalar
    # o_ref : (1, TILE_B)     f32   -- lane-dense output
    h = jnp.dot(w1_ref[...], x_ref[...], preferred_element_type=jnp.float32)
    h = jnp.maximum(h + b1_ref[...], 0.0)                   # (H, TILE_B), VPU
    # fc2: output width 1 -> VPU multiply + sublane reduce (XLU); skip the MXU.
    out = jnp.sum(h * w2_ref[...], axis=0, keepdims=True)   # (1, TILE_B)
    o_ref[...] = (out + b2_ref[0, 0]).astype(o_ref.dtype)


def _round_up(a, b):
    return (a + b - 1) // b * b


def _tiling(batch, max_tile_b):
    """Split the (128-padded) batch evenly across grid steps."""
    max_tile_b = _round_up(max(int(max_tile_b), _LANE), _LANE)
    padded128 = _round_up(max(int(batch), 1), _LANE)
    nsteps = -(-padded128 // max_tile_b)                    # cdiv
    tile_b = _round_up(-(-padded128 // nsteps), _LANE)      # even split, 128-aligned
    return nsteps, tile_b


def pack_features(x, *, max_tile_b=_DEFAULT_MAX_TILE_B):
    """Producer-side packing: (B, 13) f32 -> (16, nsteps*tile_b) bf16, feature-major.

    Fuse this into the upstream producer of x (or call it once and reuse) to
    avoid a separate HBM pass before the kernel.
    """
    batch = x.shape[0]
    nsteps, tile_b = _tiling(batch, max_tile_b)
    padded_b = nsteps * tile_b
    x_fm = jnp.pad(x, ((0, padded_b - batch), (0, _K_PAD - _K)))
    return x_fm.astype(jnp.bfloat16).T                      # (K_PAD, padded_b)


@functools.partial(jax.jit, static_argnames=("batch", "max_tile_b"))
def image_net_forward_packed(x_fm, w1, b1, w2, b2, *, batch,
                             max_tile_b=_DEFAULT_MAX_TILE_B):
    """Forward pass consuming an already feature-major bf16 input (fast path).

    x_fm: (16, padded_b) bf16 as produced by pack_features(); batch = real B.
    Returns (batch, 1) float32.
    """
    nsteps, tile_b = _tiling(batch, max_tile_b)
    padded_b = nsteps * tile_b
    assert x_fm.shape == (_K_PAD, padded_b), (
        f"x_fm shape {x_fm.shape} inconsistent with batch={batch}, "
        f"max_tile_b={max_tile_b}; use pack_features() with the same max_tile_b")

    w1_p = jnp.pad(w1, ((0, 0), (0, _K_PAD - _K))).astype(jnp.bfloat16)
    b1_col = b1.reshape(_H, 1).astype(jnp.float32)
    w2_col = w2.reshape(_H, 1).astype(jnp.float32)          # fc2.weight as a column
    b2_2d = b2.reshape(1, 1).astype(jnp.float32)

    # VMEM budget: 2x bf16 x tiles + a few (H, tile_b) f32 temporaries + out.
    # 768 B/lane is a generous upper bound; floor at 32 MiB (v5e default is 16).
    vmem_limit = int(max(32 * 2**20, 768 * tile_b))

    # Advisory cost hint for XLA scheduling around the custom call.
    cost = pl.CostEstimate(
        flops=2 * padded_b * (_K_PAD * _H + _H),
        transcendentals=0,
        bytes_accessed=int(_K_PAD * padded_b * 2          # x_fm (bf16)
                           + padded_b * 4                 # output (f32)
                           + _H * _K_PAD * 2 + (_H + _H + 1) * 4),
    )

    const = lambda i: (0, 0)     # weights/biases stay resident across the grid

    out = pl.pallas_call(
        _mlp_kernel,
        out_shape=jax.ShapeDtypeStruct((1, padded_b), jnp.float32),
        grid=(nsteps,),
        in_specs=[
            pl.BlockSpec((_K_PAD, tile_b), lambda i: (0, i)),    # x (pipelined)
            pl.BlockSpec((_H, _K_PAD), const),                   # w1 (resident)
            pl.BlockSpec((_H, 1), const),                        # b1 (resident)
            pl.BlockSpec((_H, 1), const),                        # w2 (resident)
            pl.BlockSpec(memory_space=pltpu.MemorySpace.SMEM),   # b2 scalar
        ],
        out_specs=pl.BlockSpec((1, tile_b), lambda i: (0, i)),
        compiler_params=pltpu.CompilerParams(
            dimension_semantics=("parallel",),   # v7x: shard steps over 2 TCs
            vmem_limit_bytes=vmem_limit,
        ),
        cost_estimate=cost,
    )(x_fm, w1_p, b1_col, w2_col, b2_2d)

    if padded_b == batch:
        return out.reshape(batch, 1)
    return out[0, :batch].reshape(batch, 1)


@functools.partial(jax.jit, static_argnames=("max_tile_b",))
def image_net_forward(x, w1, b1, w2, b2, *, max_tile_b=_DEFAULT_MAX_TILE_B):
    """Convenience entry: fused 2-layer MLP forward from native-layout x.

    x : (B, 13) float32
    w1: (32, 13), b1: (32,), w2: (1, 32), b2: (1,)   (PyTorch Linear layout)
    returns: (B, 1) float32

    Note: this path performs one fused pad+cast+transpose pass over x before
    the kernel.  For minimum HBM traffic, have the producer emit x via
    pack_features() and call image_net_forward_packed() directly.
    """
    x_fm = pack_features(x, max_tile_b=max_tile_b)
    return image_net_forward_packed(x_fm, w1, b1, w2, b2,
                                    batch=x.shape[0], max_tile_b=max_tile_b)


def _init_params(key):
    """PyTorch-Linear-style U(-1/sqrt(fan_in), +) init, PyTorch weight layout."""
    k1, k2, k3, k4 = jax.random.split(key, 4)
    bound1 = 1.0 / jnp.sqrt(float(_K))
    bound2 = 1.0 / jnp.sqrt(float(_H))
    w1 = jax.random.uniform(k1, (_H, _K), jnp.float32, -bound1, bound1)
    b1 = jax.random.uniform(k2, (_H,), jnp.float32, -bound1, bound1)
    w2 = jax.random.uniform(k3, (1, _H), jnp.float32, -bound2, bound2)
    b2 = jax.random.uniform(k4, (1,), jnp.float32, -bound2, bound2)
    return w1, b1, w2, b2


if __name__ == "__main__":
    key = jax.random.PRNGKey(0)
    k_x, k_p = jax.random.split(key)
    w1, b1, w2, b2 = _init_params(k_p)

    for B in (8, 200):   # small demo batch + a non-multiple-of-128 batch
        kx = jax.random.fold_in(k_x, B)
        x = jax.random.normal(kx, (B, _K), jnp.float32)

        out = jax.block_until_ready(image_net_forward(x, w1, b1, w2, b2))
        assert out.shape == (B, 1)

        # Pre-packed (producer-fused) fast path must agree exactly.
        x_fm = pack_features(x)
        out_packed = jax.block_until_ready(
            image_net_forward_packed(x_fm, w1, b1, w2, b2, batch=B))
        assert bool(jnp.allclose(out, out_packed)), f"packed-path mismatch at B={B}"

        # Reference with the same bf16 rounding of x / w1; fc2 in plain f32
        # (mirrors the kernel's f32 multiply+reduce).
        x_q = x.astype(jnp.bfloat16).astype(jnp.float32)
        w1_q = w1.astype(jnp.bfloat16).astype(jnp.float32)
        h_ref = jnp.maximum(x_q @ w1_q.T + b1, 0.0)
        ref = (h_ref * w2[0]).sum(axis=1, keepdims=True) + b2
        assert bool(jnp.allclose(out, ref, atol=2e-3, rtol=2e-3)), f"mismatch at B={B}"

    print("KERNEL_OK")
</pallas_src>

<mosaic_0001>
module attributes {stable_mosaic.version = 11 : i64} {
  func.func @_mlp_kernel(%arg0: i32, %arg1: memref<16x128xbf16, #tpu.memory_space<vmem>>, %arg2: memref<32x16xbf16, #tpu.memory_space<vmem>>, %arg3: memref<32x1xf32, #tpu.memory_space<vmem>>, %arg4: memref<32x1xf32, #tpu.memory_space<vmem>>, %arg5: memref<1x1xf32, #tpu.memory_space<smem>>, %arg6: memref<1x128xf32, #tpu.memory_space<vmem>>) attributes {dimension_semantics = [#tpu.dimension_semantics<parallel>], iteration_bounds = array<i64: 1>, scalar_prefetch = 0 : i64, scratch_operands = 0 : i64, tpu.core_type = #tpu.core_type<tc>, window_params = [{transform_indices = @transform_0, window_bounds = array<i64: 16, 128>}, {pipeline_mode = #tpu.pipeline_mode<synchronous>, transform_indices = @transform_1, window_bounds = array<i64: 32, 16>}, {pipeline_mode = #tpu.pipeline_mode<synchronous>, transform_indices = @transform_2, window_bounds = array<i64: 32, 1>}, {pipeline_mode = #tpu.pipeline_mode<synchronous>, transform_indices = @transform_3, window_bounds = array<i64: 32, 1>}, {transform_indices = @transform_4, window_bounds = array<i64: 1, 1>}, {transform_indices = @transform_5, window_bounds = array<i64: 1, 128>}]} {
    %c0 = arith.constant 0 : index
    %c0_0 = arith.constant 0 : index
    %0 = vector.load %arg2[%c0, %c0_0] : memref<32x16xbf16, #tpu.memory_space<vmem>>, vector<32x16xbf16>
    %c0_1 = arith.constant 0 : index
    %c0_2 = arith.constant 0 : index
    %1 = vector.load %arg1[%c0_1, %c0_2] : memref<16x128xbf16, #tpu.memory_space<vmem>>, vector<16x128xbf16>
    %cst = arith.constant dense<0.000000e+00> : vector<32x128xf32>
    %2 = tpu.matmul %0, %1, %cst {dimension_numbers = #tpu.dot_dimension_numbers<[1], [0], [0], [1], [0, 0, 1, 1], [], []>} : vector<32x16xbf16>, vector<16x128xbf16>, vector<32x128xf32> -> vector<32x128xf32>
    %c0_3 = arith.constant 0 : index
    %c0_4 = arith.constant 0 : index
    %3 = vector.load %arg3[%c0_3, %c0_4] : memref<32x1xf32, #tpu.memory_space<vmem>>, vector<32x1xf32>
    %4 = vector.broadcast %3 : vector<32x1xf32> to vector<32x128xf32>
    %5 = arith.addf %2, %4 : vector<32x128xf32>
    %cst_5 = arith.constant 0.000000e+00 : f32
    %6 = vector.broadcast %cst_5 : f32 to vector<32x128xf32>
    %7 = arith.maximumf %5, %6 : vector<32x128xf32>
    %c0_6 = arith.constant 0 : index
    %c0_7 = arith.constant 0 : index
    %8 = vector.load %arg4[%c0_6, %c0_7] : memref<32x1xf32, #tpu.memory_space<vmem>>, vector<32x1xf32>
    %9 = vector.broadcast %8 : vector<32x1xf32> to vector<32x128xf32>
    %10 = arith.mulf %7, %9 : vector<32x128xf32>
    %cst_8 = arith.constant dense<0.000000e+00> : vector<128xf32>
    %11 = vector.multi_reduction <add>, %10, %cst_8 [0] : vector<32x128xf32> to vector<128xf32>
    %12 = vector.shape_cast %11 : vector<128xf32> to vector<1x128xf32>
    %c0_9 = arith.constant 0 : index
    %c0_10 = arith.constant 0 : index
    %13 = memref.load %arg5[%c0_9, %c0_10] : memref<1x1xf32, #tpu.memory_space<smem>>
    %14 = vector.broadcast %13 : f32 to vector<1x128xf32>
    %15 = arith.addf %12, %14 : vector<1x128xf32>
    %c0_11 = arith.constant 0 : index
    %c0_12 = arith.constant 0 : index
    %16 = vector.load %arg6[%c0_11, %c0_12] : memref<1x128xf32, #tpu.memory_space<vmem>>, vector<1x128xf32>
    tpu.vector_store %arg6[%c0_11, %c0_12], %15 {strides = array<i32>} : memref<1x128xf32, #tpu.memory_space<vmem>>, vector<1x128xf32>,
    return
  }
  func.func @transform_0(%arg0: i32) -> (i32, i32) {
    %c0_i32 = arith.constant 0 : i32
    %c0_i32_0 = arith.constant 0 : i32
    return %c0_i32, %arg0 : i32, i32
  }
  func.func @transform_1(%arg0: i32) -> (i32, i32) {
    %c0_i32 = arith.constant 0 : i32
    %c0_i32_0 = arith.constant 0 : i32
    %c0_i32_1 = arith.constant 0 : i32
    return %c0_i32, %c0_i32_0 : i32, i32
  }
  func.func @transform_2(%arg0: i32) -> (i32, i32) {
    %c0_i32 = arith.constant 0 : i32
    %c0_i32_0 = arith.constant 0 : i32
    %c0_i32_1 = arith.constant 0 : i32
    return %c0_i32, %c0_i32_0 : i32, i32
  }
  func.func @transform_3(%arg0: i32) -> (i32, i32) {
    %c0_i32 = arith.constant 0 : i32
    %c0_i32_0 = arith.constant 0 : i32
    %c0_i32_1 = arith.constant 0 : i32
    return %c0_i32, %c0_i32_0 : i32, i32
  }
  func.func @transform_4(%arg0: i32) -> (i32, i32) {
    %c0_i32 = arith.constant 0 : i32
    %c0_i32_0 = arith.constant 0 : i32
    %c0_i32_1 = arith.constant 0 : i32
    return %c0_i32, %c0_i32_0 : i32, i32
  }
  func.func @transform_5(%arg0: i32) -> (i32, i32) {
    %c0_i32 = arith.constant 0 : i32
    %c0_i32_0 = arith.constant 0 : i32
    return %c0_i32, %arg0 : i32, i32
  }
}

</mosaic_0001>

<bundles_post_ra>
// kernel: image_net_forward_packed.1
= control target key start
LH: loop header
LB: loop body
LE: loop exit
PB: predicated region body
PF: predicated region fallthrough
CT: control target
= control target key end

     0   :  { %vm68_vm0 = vcmask 130048   ;;  %v193_v1 = vmov 0   ;;  %s265_s0 = inlined_call_operand.vmem [shape: bf16[16,128], index: 0, kind: input, shape index: {}]   ;;  %s266_s1 = inlined_call_operand.vmem [shape: bf16[32,16], index: 1, kind: input, shape index: {}]   ;;  %s267_s2 = inlined_call_operand.vmem [shape: f32[32,1], index: 2, kind: input, shape index: {}]   ;;  %s268_s3 = inlined_call_operand.vmem [shape: f32[32,1], index: 3, kind: input, shape index: {}]   ;;  %s269_s4 = inlined_call_operand.<no memory space> [shape: f32[1,1], index: 4, kind: input, shape index: {}]   ;;  %s270_s5 = inlined_call_operand.vmem [shape: f32[1,128], index: 5, kind: output, shape index: {}]  }
   0x1   :  { %v190_v0 = vld [vmem:[%s265_s0] sm:$0xff]   ;;  %188 = vset.pattern.permute.xlu0 %v193_v1  ;;  %189 = vset.pattern.permute.xlu1 %v193_v1  ;;  %v192_v3 = vld [vmem:[%s266_s1 + $0x8] sm:$0xff]   ;;  %v30_v5 = vld [vmem:[%s267_s2 + $0x10] sm:$0xff]  ;;  %v166_v44 = vstv %s269_s4 }
   0x2   :  { %v191_v2 = vld [vmem:[%s266_s1] sm:$0xff]   ;;  %181 = vmatprep.subr.bf16.mxu0 %v190_v0  ;;  %44 = vperm.xlu1 %189, %v30_v5   ;;  %v29_v6 = vld [vmem:[%s267_s2 + $0x8] sm:$0xff]  ;;  %v31_v7 = vld [vmem:[%s267_s2 + $0x18] sm:$0xff] }
   0x3   :  { %182 = vmatpush3.bf16.msra.mxu0 %v190_v0  ;;  %183 = vmatprep.mubr.msk.bf16.mxu0 %vm68_vm0, %v191_v2  ;;  %v28_v4 = vld [vmem:[%s267_s2] sm:$0xff]  ;;  %v129_v9 = vld [vmem:[%s268_s3 + $0x8] sm:$0xff]  ;;  %v130_v10 = vld [vmem:[%s268_s3 + $0x10] sm:$0xff] }
   0x4   :  { %34 = vperm.xlu0 %188, %v28_v4   ;;  %v128_v8 = vld [vmem:[%s268_s3] sm:$0xff]  ;;  %v131_v11 = vld [vmem:[%s268_s3 + $0x18] sm:$0xff] }
   0x6   :  { %184 = vmatmul.mubr.msk.bf16.vlgmr.msra.gmra.mxu0 %vm68_vm0, %v192_v3  ;;  %49 = vperm.xlu1 %189, %v31_v7  }
   0x8   :  { %39 = vperm.xlu0 %188, %v29_v6  }
   0xa   :  { %139 = vperm.xlu1 %189, %v129_v9  }
   0xc   :  { %134 = vperm.xlu0 %188, %v128_v8  }
   0xe   :  { %149 = vperm.xlu1 %189, %v131_v11  }
  0x10   :  { %144 = vperm.xlu0 %188, %v130_v10  }
  0x7d   :  { %v45_v13 = vpop.permute.xlu1 %44 }
  0x7f   :  { %v35_v12 = vpop.permute.xlu0 %34 }
  0x81   :  { %v50_v16 = vpop.permute.xlu1 %49 }
  0x83   :  { %v40_v14 = vpop.permute.xlu0 %39 }
  0x85   :  { %v140_v26 = vpop.permute.xlu1 %139 }
  0x87   :  { %v135_v21 = vpop.permute.xlu0 %134 }
  0x89   :  { %v150_v35 = vpop.permute.xlu1 %149 }
  0x8b   :  { %v145_v32 = vpop.permute.xlu0 %144 }
  0xc6   :  { %v185_v15 = vpop.f32.mrf.mxu0 }
  0xc7   :  { %v118_v20 = vadd.f32 %v185_v15, %v45_v13 }
  0xc8   :  { %v109_v17 = vpop.f32.mrf.mxu0 }
  0xc9   :  { %v110_v18 = vadd.f32 %v109_v17, %v35_v12  ;;  %v126_v27 = vmax.f32 %v118_v20, 0.0 }
  0xca   :  { %v186_v19 = vpop.f32.mrf.mxu0 }
  0xcb   :  { %v124_v23 = vmax.f32 %v110_v18, 0.0  ;;  %v121_v24 = vadd.f32 %v186_v19, %v50_v16  ;;  %v154_v33 = vmul.f32 %v145_v32, %v126_v27 }
  0xcc   :  { %v112_v22 = vpop.f32.mrf.mxu0 }
  0xcd   :  { %v113_v25 = vadd.f32 %v112_v22, %v40_v14  ;;  %v152_v29 = vmul.f32 %v135_v21, %v124_v23  ;;  %v127_v30 = vmax.f32 %v121_v24, 0.0 }
  0xcf   :  { %v125_v28 = vmax.f32 %v113_v25, 0.0  ;;  %v155_v36 = vmul.f32 %v150_v35, %v127_v30 }
  0xd1   :  { %v153_v31 = vmul.f32 %v140_v26, %v125_v28 }
  0xd3   :  { %v156_v34 = vadd.f32 %v153_v31, %v152_v29 }
  0xd5   :  { %v157_v37 = vadd.f32 %v156_v34, %v154_v33 }
  0xd7   :  { %v158_v38 = vadd.f32 %v157_v37, %v155_v36 }
  0xd9   :  { %v159_v39 = vrot.slane %v158_v38, 4 }
  0xdb   :  { %v160_v40 = vadd.f32 %v159_v39, %v158_v38 }
  0xdd   :  { %v161_v41 = vrot.slane %v160_v40, 2 }
  0xdf   :  { %v162_v42 = vadd.f32 %v161_v41, %v160_v40 }
  0xe1   :  { %v163_v43 = vrot.slane %v162_v42, 1 }
  0xe3   :  { %v164_v45 = vadd.f32 %v163_v43, %v162_v42 }
  0xe5   :  { %v167_v46 = vadd.f32 %v166_v44, %v164_v45 }
  0xe7   :  { %168 = vst [vmem:[%s270_s5] sm:$0x1] %v167_v46 }

</bundles_post_ra>
